<compile_context>
chip_gen: v7x
topology: tpu7x:2x2x1
jax: 0.10.0
libtpu: 0.0.40
codegen_flags: <defaults>
</compile_context>

<pallas_src>
import functools

import jax
import jax.numpy as jnp
import numpy as np
from jax.experimental import pallas as pl
from jax.experimental.pallas import tpu as pltpu

NUM_CLASSES_AGE = 9
EPS = 1e-5
OUT_PAD = 128  # lane-dense fused output width (>= clases_age + 2)


# ----------------------------------------------------------------------------
# Kernel
# ----------------------------------------------------------------------------
def frotend_kernel(x_ref, w1_ref, bn_ref, w2_ref, b2_ref, out_ref, *, gender_col):
    x = x_ref[...]                              # (B, D) f32

    bn = bn_ref[...]                            # (3, 3D): rows = [b1, gamma, beta]
    b1 = bn[0:1, :]
    gamma = bn[1:2, :]
    beta = bn[2:3, :]

    # Fused Linear1 for all three heads: (B, D) @ (D, 3D) -> (B, 3D)
    h = jnp.dot(x, w1_ref[...], preferred_element_type=jnp.float32) + b1
    h = jnp.maximum(h, 0.0)                     # ReLU

    # BatchNorm1d, training-mode semantics (batch mean, biased batch variance),
    # computed with a single reduction pass over the batch axis.
    inv_b = 1.0 / h.shape[0]
    mean = jnp.sum(h, axis=0, keepdims=True) * inv_b
    ex2 = jnp.sum(h * h, axis=0, keepdims=True) * inv_b
    var = jnp.maximum(ex2 - mean * mean, 0.0)
    h = (h - mean) * (jax.lax.rsqrt(var + EPS) * gamma) + beta

    # Fused block-diagonal Linear2: (B, 3D) @ (3D, OUT_PAD) -> (B, OUT_PAD)
    out = jnp.dot(h, w2_ref[...], preferred_element_type=jnp.float32) + b2_ref[...]

    # Sigmoid only on the gender column of the fused output tile.
    col = jax.lax.broadcasted_iota(jnp.int32, out.shape, 1)
    out_ref[...] = jnp.where(col == gender_col, jax.nn.sigmoid(out), out)


# ----------------------------------------------------------------------------
# Parameter construction / packing
# ----------------------------------------------------------------------------
def make_params(key, dim_inicial, clases_age=NUM_CLASSES_AGE):
    """Per-head params mimicking nn.Linear / nn.BatchNorm1d default init.

    Linear weights stored transposed as (in, out); biases / BN params as (1, n).
    Returns a tuple of three heads, each (w1, b1, gamma, beta, w2, b2).
    """
    D = dim_inicial

    def linear(key, fan_in, fan_out):
        kw, kb = jax.random.split(key)
        bound = 1.0 / np.sqrt(fan_in)
        w = jax.random.uniform(kw, (fan_in, fan_out), jnp.float32, -bound, bound)
        b = jax.random.uniform(kb, (1, fan_out), jnp.float32, -bound, bound)
        return w, b

    def head(key, out_dim):
        k1, k2 = jax.random.split(key)
        w1, b1 = linear(k1, D, D)
        gamma = jnp.ones((1, D), jnp.float32)
        beta = jnp.zeros((1, D), jnp.float32)
        w2, b2 = linear(k2, D, out_dim)
        return (w1, b1, gamma, beta, w2, b2)

    k_age, k_gen, k_reg = jax.random.split(key, 3)
    return (head(k_age, clases_age), head(k_gen, 1), head(k_reg, 1))


def pack_params(raw, clases_age=NUM_CLASSES_AGE, out_pad=OUT_PAD):
    """Pack the 18 per-head tensors into 4 kernel inputs."""
    assert out_pad >= clases_age + 2
    (aw1, ab1, ag, abe, aw2, ab2) = raw[0]   # age classification head
    (gw1, gb1, gg, gbe, gw2, gb2) = raw[1]   # gender head
    (rw1, rb1, rg, rbe, rw2, rb2) = raw[2]   # age regression head
    D = aw1.shape[0]

    # Fused first-layer weights: (D, 3D)
    w1_all = jnp.concatenate([aw1, gw1, rw1], axis=1)

    # Bias / BN scale / BN shift stacked as rows: (3, 3D)
    bn_all = jnp.stack(
        [
            jnp.concatenate([ab1, gb1, rb1], axis=1)[0],
            jnp.concatenate([ag, gg, rg], axis=1)[0],
            jnp.concatenate([abe, gbe, rbe], axis=1)[0],
        ],
        axis=0,
    )

    # Block-diagonal fused second-layer weights: (3D, out_pad)
    w2_all = jnp.zeros((3 * D, out_pad), jnp.float32)
    w2_all = w2_all.at[0:D, 0:clases_age].set(aw2)
    w2_all = w2_all.at[D:2 * D, clases_age:clases_age + 1].set(gw2)
    w2_all = w2_all.at[2 * D:3 * D, clases_age + 1:clases_age + 2].set(rw2)

    b2_all = jnp.zeros((1, out_pad), jnp.float32)
    b2_all = b2_all.at[:, 0:clases_age].set(ab2)
    b2_all = b2_all.at[:, clases_age:clases_age + 1].set(gb2)
    b2_all = b2_all.at[:, clases_age + 1:clases_age + 2].set(rb2)

    return (w1_all, bn_all, w2_all, b2_all)


# ----------------------------------------------------------------------------
# Forward wrapper
# ----------------------------------------------------------------------------
@functools.partial(jax.jit, static_argnames=("clases_age",))
def frotend_forward(x, packed, clases_age=NUM_CLASSES_AGE):
    w1_all, bn_all, w2_all, b2_all = packed
    B = x.shape[0]
    out_pad = w2_all.shape[1]
    vmem = pl.BlockSpec(memory_space=pltpu.MemorySpace.VMEM)

    out = pl.pallas_call(
        functools.partial(frotend_kernel, gender_col=clases_age),
        out_shape=jax.ShapeDtypeStruct((B, out_pad), jnp.float32),
        in_specs=[vmem] * 5,
        out_specs=vmem,
    )(x, w1_all, bn_all, w2_all, b2_all)

    # Slice the fused lane-dense output; sigmoid was applied in-kernel.
    age = out[:, :clases_age]
    gender = out[:, clases_age]                 # == .squeeze().float() glue
    reg = out[:, clases_age + 1]
    return age, gender.astype(jnp.float32), reg.astype(jnp.float32)


# ----------------------------------------------------------------------------
# Pure-JAX reference (original per-head, two-pass-BN formulation)
# ----------------------------------------------------------------------------
def _reference(x, raw):
    def head(x, w1, b1, gamma, beta, w2, b2):
        h = jnp.maximum(x @ w1 + b1, 0.0)
        mean = jnp.mean(h, axis=0, keepdims=True)
        var = jnp.mean((h - mean) ** 2, axis=0, keepdims=True)
        h = (h - mean) / jnp.sqrt(var + EPS) * gamma + beta
        return h @ w2 + b2

    age = head(x, *raw[0])
    gender = jax.nn.sigmoid(head(x, *raw[1])).squeeze(-1)
    reg = head(x, *raw[2]).squeeze(-1)
    return age, gender, reg


if __name__ == "__main__":
    B, D = 4, 32  # small shapes consistent with the module (dim_inicial = 32)
    key = jax.random.PRNGKey(0)
    kx, kp = jax.random.split(key)

    x = jax.random.normal(kx, (B, D), dtype=jnp.float32)
    raw = make_params(kp, D)
    packed = pack_params(raw)

    age, gender, reg = frotend_forward(x, packed)
    jax.block_until_ready((age, gender, reg))

    # correctness check against pure-JAX reference on the unpacked parameters
    age_r, gender_r, reg_r = _reference(x, raw)
    np.testing.assert_allclose(np.asarray(age), np.asarray(age_r), rtol=1e-4, atol=1e-4)
    np.testing.assert_allclose(np.asarray(gender), np.asarray(gender_r), rtol=1e-4, atol=1e-4)
    np.testing.assert_allclose(np.asarray(reg), np.asarray(reg_r), rtol=1e-4, atol=1e-4)

    assert age.shape == (B, NUM_CLASSES_AGE)
    assert gender.shape == (B,)
    assert reg.shape == (B,)

    print("KERNEL_OK")
</pallas_src>

<mosaic_0001>
module attributes {stable_mosaic.version = 11 : i64} {
  func.func @frotend_kernel(%arg0: memref<4x32xf32, #tpu.memory_space<vmem>>, %arg1: memref<32x96xf32, #tpu.memory_space<vmem>>, %arg2: memref<3x96xf32, #tpu.memory_space<vmem>>, %arg3: memref<96x128xf32, #tpu.memory_space<vmem>>, %arg4: memref<1x128xf32, #tpu.memory_space<vmem>>, %arg5: memref<4x128xf32, #tpu.memory_space<vmem>>) attributes {dimension_semantics = [], scalar_prefetch = 0 : i64, scratch_operands = 0 : i64, tpu.core_type = #tpu.core_type<tc>} {
    %c0 = arith.constant 0 : index
    %c0_0 = arith.constant 0 : index
    %0 = vector.load %arg0[%c0, %c0_0] : memref<4x32xf32, #tpu.memory_space<vmem>>, vector<4x32xf32>
    %c0_1 = arith.constant 0 : index
    %c0_2 = arith.constant 0 : index
    %1 = vector.load %arg2[%c0_1, %c0_2] : memref<3x96xf32, #tpu.memory_space<vmem>>, vector<3x96xf32>
    %2 = vector.extract_strided_slice %1 {offsets = [0, 0], sizes = [1, 96], strides = [1, 1]} : vector<3x96xf32> to vector<1x96xf32>
    %3 = vector.extract_strided_slice %1 {offsets = [1, 0], sizes = [1, 96], strides = [1, 1]} : vector<3x96xf32> to vector<1x96xf32>
    %4 = vector.extract_strided_slice %1 {offsets = [2, 0], sizes = [1, 96], strides = [1, 1]} : vector<3x96xf32> to vector<1x96xf32>
    %c0_3 = arith.constant 0 : index
    %c0_4 = arith.constant 0 : index
    %5 = vector.load %arg1[%c0_3, %c0_4] : memref<32x96xf32, #tpu.memory_space<vmem>>, vector<32x96xf32>
    %cst = arith.constant dense<0.000000e+00> : vector<4x96xf32>
    %6 = tpu.matmul %0, %5, %cst {dimension_numbers = #tpu.dot_dimension_numbers<[1], [0], [0], [1], [0, 0, 1, 1], [], []>} : vector<4x32xf32>, vector<32x96xf32>, vector<4x96xf32> -> vector<4x96xf32>
    %7 = vector.broadcast %2 : vector<1x96xf32> to vector<4x96xf32>
    %8 = arith.addf %6, %7 : vector<4x96xf32>
    %cst_5 = arith.constant 0.000000e+00 : f32
    %9 = vector.broadcast %cst_5 : f32 to vector<4x96xf32>
    %10 = arith.maximumf %8, %9 : vector<4x96xf32>
    %cst_6 = arith.constant dense<0.000000e+00> : vector<96xf32>
    %11 = vector.multi_reduction <add>, %10, %cst_6 [0] : vector<4x96xf32> to vector<96xf32>
    %12 = vector.shape_cast %11 : vector<96xf32> to vector<1x96xf32>
    %cst_7 = arith.constant 2.500000e-01 : f32
    %13 = vector.broadcast %cst_7 : f32 to vector<1x96xf32>
    %14 = arith.mulf %12, %13 : vector<1x96xf32>
    %15 = arith.mulf %10, %10 : vector<4x96xf32>
    %cst_8 = arith.constant dense<0.000000e+00> : vector<96xf32>
    %16 = vector.multi_reduction <add>, %15, %cst_8 [0] : vector<4x96xf32> to vector<96xf32>
    %17 = vector.shape_cast %16 : vector<96xf32> to vector<1x96xf32>
    %cst_9 = arith.constant 2.500000e-01 : f32
    %18 = vector.broadcast %cst_9 : f32 to vector<1x96xf32>
    %19 = arith.mulf %17, %18 : vector<1x96xf32>
    %20 = arith.mulf %14, %14 : vector<1x96xf32>
    %21 = arith.subf %19, %20 : vector<1x96xf32>
    %cst_10 = arith.constant 0.000000e+00 : f32
    %22 = vector.broadcast %cst_10 : f32 to vector<1x96xf32>
    %23 = arith.maximumf %21, %22 : vector<1x96xf32>
    %24 = vector.broadcast %14 : vector<1x96xf32> to vector<4x96xf32>
    %25 = arith.subf %10, %24 : vector<4x96xf32>
    %cst_11 = arith.constant 9.99999974E-6 : f32
    %26 = vector.broadcast %cst_11 : f32 to vector<1x96xf32>
    %27 = arith.addf %23, %26 : vector<1x96xf32>
    %28 = math.rsqrt %27 : vector<1x96xf32>
    %29 = arith.mulf %28, %3 : vector<1x96xf32>
    %30 = vector.broadcast %29 : vector<1x96xf32> to vector<4x96xf32>
    %31 = arith.mulf %25, %30 : vector<4x96xf32>
    %32 = vector.broadcast %4 : vector<1x96xf32> to vector<4x96xf32>
    %33 = arith.addf %31, %32 : vector<4x96xf32>
    %c0_12 = arith.constant 0 : index
    %c0_13 = arith.constant 0 : index
    %34 = vector.load %arg3[%c0_12, %c0_13] : memref<96x128xf32, #tpu.memory_space<vmem>>, vector<96x128xf32>
    %cst_14 = arith.constant dense<0.000000e+00> : vector<4x128xf32>
    %35 = tpu.matmul %33, %34, %cst_14 {dimension_numbers = #tpu.dot_dimension_numbers<[1], [0], [0], [1], [0, 0, 1, 1], [], []>} : vector<4x96xf32>, vector<96x128xf32>, vector<4x128xf32> -> vector<4x128xf32>
    %c0_15 = arith.constant 0 : index
    %c0_16 = arith.constant 0 : index
    %36 = vector.load %arg4[%c0_15, %c0_16] : memref<1x128xf32, #tpu.memory_space<vmem>>, vector<1x128xf32>
    %37 = vector.broadcast %36 : vector<1x128xf32> to vector<4x128xf32>
    %38 = arith.addf %35, %37 : vector<4x128xf32>
    %39 = tpu.iota {dimensions = array<i32: 1>} : vector<4x128xi32>
    %c9_i32 = arith.constant 9 : i32
    %40 = vector.broadcast %c9_i32 : i32 to vector<4x128xi32>
    %41 = arith.cmpi eq, %39, %40 : vector<4x128xi32>
    %42 = arith.negf %38 : vector<4x128xf32>
    %43 = math.exp %42 : vector<4x128xf32>
    %cst_17 = arith.constant 1.000000e+00 : f32
    %44 = vector.broadcast %cst_17 : f32 to vector<4x128xf32>
    %45 = arith.addf %44, %43 : vector<4x128xf32>
    %46 = arith.divf %44, %45 : vector<4x128xf32>
    %47 = arith.select %41, %46, %38 : vector<4x128xi1>, vector<4x128xf32>
    %c0_18 = arith.constant 0 : index
    %c0_19 = arith.constant 0 : index
    %48 = vector.load %arg5[%c0_18, %c0_19] : memref<4x128xf32, #tpu.memory_space<vmem>>, vector<4x128xf32>
    tpu.vector_store %arg5[%c0_18, %c0_19], %47 {strides = array<i32>} : memref<4x128xf32, #tpu.memory_space<vmem>>, vector<4x128xf32>,
    return
  }
}

</mosaic_0001>

<bundles_post_ra>
// kernel: frotend_forward.1
= control target key start
LH: loop header
LB: loop body
LE: loop exit
PB: predicated region body
PF: predicated region fallthrough
CT: control target
= control target key end

     0   :  { %10 = vsyncpa [#allocation3], 0  ;;  %s546_s0 = inlined_call_operand.hbm [shape: f32[4,32], index: 0, kind: input, shape index: {}]   ;;  %s547_s1 = inlined_call_operand.hbm [shape: f32[32,96], index: 1, kind: input, shape index: {}]   ;;  %s548_s2 = inlined_call_operand.vmem [shape: f32[3,96], index: 2, kind: input, shape index: {}]   ;;  %s549_s3 = inlined_call_operand.hbm [shape: f32[96,128], index: 3, kind: input, shape index: {}]   ;;  %s550_s4 = inlined_call_operand.vmem [shape: f32[1,128], index: 4, kind: input, shape index: {}]   ;;  %s551_s5 = inlined_call_operand.vmem [shape: f32[4,128], index: 5, kind: output, shape index: {}]  }
   0x1   :  { %11 = vsyncpa [#allocation5], 0  ;;  %s457_s18 = smov [#allocation4]   ;;  %s387_s22 = scalar_lea.hbm %s547_s1, 512 }
   0x2   :  { %s27_s19 = sshll.u32 %s457_s18, 4  ;;  %p388_p0 = scmp.ne.s32.totalorder %s547_s1, %s387_s22  ;;  %s28_s19 = int_to_ptr.vmem [resolvable:$true] %s27_s19 }
   0x3   :  { %p391_p1 = scmp.lt.u32.totalorder %s387_s22, %s547_s1 }
   0x5   :  { %p393_p2 = pnand %p391_p1, %p388_p0 }
   0x7   :  { %396 = shalt.err (!%p393_p2)
}
   0x8   :  { %s397_s27 = scalar_lea.vmem %s28_s19, 512  ;;  %p402_p4 = scmp.lt.s32.totalorder %s28_s19, %s28_s19 }
   0x9   :  { %p398_p3 = scmp.ne.s32.totalorder %s28_s19, %s397_s27  ;;  %p403_p5 = scmp.lt.s32.totalorder %s397_s27, %s397_s27 }
   0xb   :  { %p404_p6 = por %p403_p5, %p402_p4 }
   0xd   :  { %p405_p7 = pnand %p404_p6, %p398_p3 }
   0xf   :  { %408 = shalt.err (!%p405_p7)
}
  0x10   :  { %s458_s28 = smov 128   ;;  %s459_s29 = smov 8  }
  0x11   :  { %33 = dma.hbm_to_vmem [thread:$0]  %s547_s1, 512, %s28_s19, [#allocation5], %s458_s28, %s458_s28, %s459_s29  }
  0x12   :  { %s460_s7 = smov [#allocation2]   ;;  %s461_s9 = smov [#allocation6]  }
  0x13   :  { %s18_s8 = sshll.u32 %s460_s7, 4  ;;  %s41_s10 = sshll.u32 %s461_s9, 4  ;;  %s19_s8 = int_to_ptr.vmem [resolvable:$true] %s18_s8  ;;  %s42_s10 = int_to_ptr.vmem [resolvable:$true] %s41_s10 }
  0x14   :  { %s409_s13 = scalar_lea.hbm %s546_s0, 64 }
  0x15   :  { %p410_p8 = scmp.ne.s32.totalorder %s546_s0, %s409_s13  ;;  %p413_p9 = scmp.lt.u32.totalorder %s409_s13, %s546_s0 }
  0x17   :  { %p415_p10 = pnand %p413_p9, %p410_p8 }
  0x19   :  { %418 = shalt.err (!%p415_p10)
}
  0x1a   :  { %s419_s1 = scalar_lea.vmem %s19_s8, 64  ;;  %p424_p12 = scmp.lt.s32.totalorder %s19_s8, %s19_s8 }
  0x1b   :  { %p420_p11 = scmp.ne.s32.totalorder %s19_s8, %s419_s1  ;;  %p425_p13 = scmp.lt.s32.totalorder %s419_s1, %s419_s1 }
  0x1d   :  { %p426_p0 = por %p425_p13, %p424_p12 }
  0x1f   :  { %p427_p1 = pnand %p426_p0, %p420_p11 }
  0x21   :  { %430 = shalt.err (!%p427_p1)
}
  0x22   :  { %21 = dma.hbm_to_vmem [thread:$0]  %s546_s0, 64, %s19_s8, [#allocation3]  }
  0x23   :  { %s431_s22 = scalar_lea.hbm %s549_s3, 1536 }
  0x24   :  { %p432_p2 = scmp.ne.s32.totalorder %s549_s3, %s431_s22  ;;  %p435_p3 = scmp.lt.u32.totalorder %s431_s22, %s549_s3 }
  0x26   :  { %p437_p4 = pnand %p435_p3, %p432_p2 }
  0x28   :  { %440 = shalt.err (!%p437_p4)
}
  0x29   :  { %s441_s27 = scalar_lea.vmem %s42_s10, 1536  ;;  %p446_p6 = scmp.lt.s32.totalorder %s42_s10, %s42_s10 }
  0x2a   :  { %p442_p5 = scmp.ne.s32.totalorder %s42_s10, %s441_s27  ;;  %p447_p7 = scmp.lt.s32.totalorder %s441_s27, %s441_s27 }
  0x2c   :  { %p448_p8 = por %p447_p7, %p446_p6 }
  0x2e   :  { %p449_p9 = pnand %p448_p8, %p442_p5 }
  0x30   :  { %452 = shalt.err (!%p449_p9)
}
  0x31   :  { %47 = dma.hbm_to_vmem [thread:$0]  %s549_s3, 1536, %s42_s10, [#allocation5], %s458_s28, %s458_s28, %s459_s29  }
  0x32   :  { %453 = dma.done.wait [#allocation3], 64  }
  0x33   :  { %454 = vsyncadd [#allocation3], 4294967232 }
  0x34   :  { %455 = dma.done.wait [#allocation5], 2048  }
  0x35   :  { %456 = vsyncadd [#allocation5], 4294965248  ;;  %v462_v0 = vmov 0.0|0.0   ;;  %vm463_vm0 = vmmov 0   ;;  %v464_v1 = vmov 0.0   ;;  %v61_v2 = vld [vmem:[#allocation4] sm:$0xff]  ;;  %v65_v27 = vlaneseq }
  0x36   :  { %349 = vmatprep.subr.bf16.mxu0 %v462_v0  ;;  %319 = vmatprep.mubr.msk.f32.mxu0 %vm463_vm0, %v464_v1  ;;  %v62_v3 = vld [vmem:[#allocation4 + $0x8] sm:$0xff]  ;;  %v63_v4 = vld [vmem:[#allocation4 + $0x10] sm:$0xff]  ;;  %v64_v6 = vld [vmem:[#allocation4 + $0x18] sm:$0xff]  ;;  %vm69_vm1 = vcmask 261120   ;;  %vm144_vm2 = vcmask 781312   ;;  %vm198_vm3 = vcmask 785408  }
  0x37   :  { %355 = vmatprep.subr.bf16.mxu1 %v462_v0  ;;  %346 = vmatprep.mubr.msk.f32.mxu1 %vm463_vm0, %v464_v1  ;;  %v350_v5 = vpack.c.bf16 %v62_v3, %v61_v2  ;;  %v353_v7 = vpack.c.bf16 %v64_v6, %v63_v4  ;;  %v59_v8 = vld [vmem:[#allocation2] sm:$0xf]  ;;  %v179_v9 = vld [vmem:[#allocation6] sm:$0xff]  ;;  %v180_v10 = vld [vmem:[#allocation6 + $0x8] sm:$0xff]  ;;  %v66_v28 = vshrl.u32 %v65_v27, 7 }
  0x38   :  { %v356_v11 = vpack.c.bf16 %v180_v10, %v179_v9  ;;  %v181_v12 = vld [vmem:[#allocation6 + $0x10] sm:$0xff]  ;;  %v182_v13 = vld [vmem:[#allocation6 + $0x18] sm:$0xff]  ;;  %v183_v15 = vld [vmem:[#allocation6 + $0x20] sm:$0xff]  ;;  %v273_v9 = vand.u32 127, %v65_v27 }
  0x39   :  { %351 = vmatpush3.bf16.msra.mxu0 %v350_v5  ;;  %v359_v14 = vpack.c.bf16 %v182_v13, %v181_v12  ;;  %v184_v16 = vld [vmem:[#allocation6 + $0x28] sm:$0xff]  ;;  %v185_v18 = vld [vmem:[#allocation6 + $0x30] sm:$0xff]  ;;  %v186_v19 = vld [vmem:[#allocation6 + $0x38] sm:$0xff]  ;;  %v67_v29 = vsub.s32 0, %v66_v28  ;;  %v171_v57 = vsub.s32 1, %v66_v28  ;;  %v176_v58 = vsub.s32 2, %v66_v28 }
  0x3a   :  { %352 = vmatprep.subr.bf16.mxu0 %v462_v0  ;;  %357 = vmatpush3.bf16.msra.mxu1 %v356_v11  ;;  %v362_v17 = vpack.c.bf16 %v184_v16, %v183_v15  ;;  %v365_v20 = vpack.c.bf16 %v186_v19, %v185_v18  ;;  %v187_v21 = vld [vmem:[#allocation6 + $0x40] sm:$0xff]  ;;  %v188_v22 = vld [vmem:[#allocation6 + $0x48] sm:$0xff]  ;;  %v189_v24 = vld [vmem:[#allocation6 + $0x50] sm:$0xff]  ;;  %vm274_vm4 = vcmp.eq.s32.totalorder %v273_v9, 9 }
  0x3b   :  { %358 = vmatprep.subr.bf16.mxu1 %v462_v0  ;;  %v368_v23 = vpack.c.bf16 %v188_v22, %v187_v21  ;;  %v190_v25 = vld [vmem:[#allocation6 + $0x58] sm:$0xff]  ;;  %v60_v30 = vld [vmem:[%s548_s2] sm:$0x7] }
  0x3c   :  { %v371_v26 = vpack.c.bf16 %v190_v25, %v189_v24  ;;  %v68_v31 = vrot.slane %v60_v30, %v67_v29  ;;  %v177_v63 = vrot.slane %v60_v30, %v176_v58  ;;  %v290_v2 = vld [vmem:[%s550_s4] ss:$0 sm:$0xff] }
  0x3d   :  { %354 = vmatpush3.bf16.msra.mxu0 %v353_v7 }
  0x3e   :  { %360 = vmatpush3.bf16.msra.mxu1 %v359_v14 }
  0x3f   :  { %361 = vmatprep.subr.bf16.mxu1 %v462_v0 }
  0x40   :  { %320 = vmatmul.mubr.msk.f32.vlgmr.msra.gmra.mrb[0].mxu0 %vm69_vm1, %v59_v8 }
  0x42   :  { %363 = vmatpush3.bf16.msra.mxu1 %v362_v17 }
  0x43   :  { %364 = vmatprep.subr.bf16.mxu1 %v462_v0 }
  0x46   :  { %366 = vmatpush3.bf16.msra.mxu1 %v365_v20 }
  0x47   :  { %367 = vmatprep.subr.bf16.mxu1 %v462_v0 }
  0x4a   :  { %369 = vmatpush3.bf16.msra.mxu1 %v368_v23 }
  0x4b   :  { %370 = vmatprep.subr.bf16.mxu1 %v462_v0 }
  0x4e   :  { %372 = vmatpush3.bf16.msra.mxu1 %v371_v26 }
 0x113   :  { %v139_v32 = vpop.f32.mrb[0].mxu0 }
 0x114   :  { %v140_v33 = vadd.f32 %v139_v32, %v68_v31  ;;  %v321_v34 = vpop.f32.mrb[1].mxu0 }
 0x116   :  { %v143_v35 = vmax.f32 %v140_v33, 0.0 }
 0x118   :  { %v145_v36 = vsel %vm144_vm2, %v143_v35, 0.0  ;;  %v153_v37 = vmul.f32 %v143_v35, %v143_v35 }
 0x119   :  { %v146_v38 = vrot.slane %v145_v36, 4 }
 0x11a   :  { %v154_v39 = vsel %vm144_vm2, %v153_v37, 0.0 }
 0x11b   :  { %v147_v40 = vadd.f32 %v146_v38, %v145_v36  ;;  %v155_v41 = vrot.slane %v154_v39, 4 }
 0x11d   :  { %v148_v42 = vrot.slane %v147_v40, 2  ;;  %v156_v43 = vadd.f32 %v155_v41, %v154_v39 }
 0x11f   :  { %v149_v44 = vadd.f32 %v148_v42, %v147_v40  ;;  %v157_v45 = vrot.slane %v156_v43, 2 }
 0x121   :  { %v150_v46 = vrot.slane %v149_v44, 1  ;;  %v158_v47 = vadd.f32 %v157_v45, %v156_v43 }
 0x123   :  { %v151_v48 = vadd.f32 %v150_v46, %v149_v44  ;;  %v159_v49 = vrot.slane %v158_v47, 1 }
 0x125   :  { %v152_v50 = vmul.f32 0.25, %v151_v48  ;;  %v160_v51 = vadd.f32 %v159_v49, %v158_v47 }
 0x127   :  { %v161_v52 = vmul.f32 0.25, %v160_v51  ;;  %v162_v53 = vmul.f32 %v152_v50, %v152_v50  ;;  %v165_v61 = vsub.f32 %v143_v35, %v152_v50 }
 0x129   :  { %v163_v54 = vsub.f32 %v161_v52, %v162_v53 }
 0x12b   :  { %v164_v55 = vmax.f32 %v163_v54, 0.0 }
 0x12d   :  { %v166_v56 = vadd.f32 1e-05, %v164_v55 }
 0x12f   :  { %381 = vrsqrt.f32 %v166_v56 }
 0x139   :  { %v382_v59 = vpop.eup %381 }
 0x13a   :  { %v168_v60 = vmul.f32 %v382_v59, %v60_v30 }
 0x13c   :  { %v172_v62 = vrot.slane %v168_v60, %v171_v57 }
 0x13e   :  { %v173_v0 = vmul.f32 %v172_v62, %v165_v61 }
 0x140   :  { %v178_v1 = vadd.f32 %v177_v63, %v173_v0 }
 0x142   :  { %347 = vmatmul.mubr.msk.f32.vlgmr.msra.gmra.mrb[0].mxu1 %vm198_vm3, %v178_v1 }
 0x215   :  { %v268_v3 = vpop.f32.mrb[0].mxu1 }
 0x216   :  { %v269_v4 = vadd.f32 %v290_v2, %v268_v3  ;;  %v348_v5 = vpop.f32.mrb[1].mxu1 }
 0x218   :  { %v292_v6 = vmul.f32 -1.442695, %v269_v4 }
 0x21a   :  { %383 = vpow2.f32 %v292_v6 }
 0x224   :  { %v384_v7 = vpop.eup %383 }
 0x225   :  { %v278_v8 = vadd.f32 1.0, %v384_v7 }
 0x227   :  { %385 = vrcp.f32 %v278_v8 }
 0x231   :  { %v386_v10 = vpop.eup %385 }
 0x232   :  { %v281_v11 = vsel %vm274_vm4, %v386_v10, %v269_v4 }
 0x233   :  { %282 = vst [vmem:[%s551_s5] sm:$0xf] %v281_v11 }
 0x234   :  { %287 = vsyncpa [#allocation3], 1 }
 0x235   :  { %288 = vsyncpa [#allocation5], 1 }

</bundles_post_ra>
